<compile_context>
chip_gen: v7x
topology: tpu7x:2x2x1
jax: 0.10.0
libtpu: 0.0.40
codegen_flags: <defaults>
</compile_context>

<pallas_src>
from functools import partial

import jax
import jax.numpy as jnp
from jax.experimental import pallas as pl
from jax.experimental.pallas import tpu as pltpu

# q @ k^T via dot_general (contract the last dim of both operands) so no
# explicit transpose is materialized inside the kernel.
_NT_DIMS = (((1,), (1,)), ((), ()))


# ---------------- fused LayerNorm -> QKV projection (3 outputs) --------------

def _ln_qkv_kernel(x_ref, g_ref, b_ref, wq_ref, wk_ref, wv_ref,
                   bq_ref, bk_ref, bv_ref, q_ref, k_ref, v_ref, *, eps):
    x = x_ref[0].astype(jnp.float32)                       # (N, C)
    mu = jnp.mean(x, axis=-1, keepdims=True)
    xc = x - mu
    var = jnp.mean(xc * xc, axis=-1, keepdims=True)
    y = xc * jax.lax.rsqrt(var + eps)
    y = y * g_ref[...].astype(jnp.float32) + b_ref[...].astype(jnp.float32)
    y = y.astype(wq_ref.dtype)          # MXU-native operand dtype (no f32 up-cast)

    q = jnp.dot(y, wq_ref[...], preferred_element_type=jnp.float32)
    k = jnp.dot(y, wk_ref[...], preferred_element_type=jnp.float32)
    v = jnp.dot(y, wv_ref[...], preferred_element_type=jnp.float32)
    q_ref[0] = (q + bq_ref[...].astype(jnp.float32)).astype(q_ref.dtype)
    k_ref[0] = (k + bk_ref[...].astype(jnp.float32)).astype(k_ref.dtype)
    v_ref[0] = (v + bv_ref[...].astype(jnp.float32)).astype(v_ref.dtype)


def ln_qkv(x, gamma, beta, wq, wk, wv, bq, bk, bv, *, eps=1e-5):
    B, N, C = x.shape
    spec_x = pl.BlockSpec((1, N, C), lambda i: (i, 0, 0))
    spec_vec = pl.BlockSpec((1, C), lambda i: (0, 0))      # constant -> stays resident
    spec_w = pl.BlockSpec((C, C), lambda i: (0, 0))        # constant -> stays resident
    out = jax.ShapeDtypeStruct((B, N, C), x.dtype)
    return pl.pallas_call(
        partial(_ln_qkv_kernel, eps=eps),
        out_shape=(out, out, out),
        grid=(B,),
        in_specs=[spec_x, spec_vec, spec_vec,
                  spec_w, spec_w, spec_w,
                  spec_vec, spec_vec, spec_vec],
        out_specs=(spec_x, spec_x, spec_x),
        compiler_params=pltpu.CompilerParams(dimension_semantics=("parallel",)),
    )(x, gamma, beta, wq, wk, wv, bq, bk, bv)


# ------------------------------ attention core -------------------------------

def _attention_kernel(q_ref, k_ref, v_ref, o_ref, *, scale, num_heads, head_dim):
    # One batch element per grid step; all heads handled in-kernel so the
    # output store is the full lane-dense (N, C) tile.
    q = q_ref[0]                                           # (N, C) native dtype
    k = k_ref[0]
    v = v_ref[0]
    outs = []
    for h in range(num_heads):                             # static unroll over heads
        lo, hi = h * head_dim, (h + 1) * head_dim
        qh, kh, vh = q[:, lo:hi], k[:, lo:hi], v[:, lo:hi]
        s = jax.lax.dot_general(qh, kh, _NT_DIMS,
                                preferred_element_type=jnp.float32) * scale
        s = s - jnp.max(s, axis=-1, keepdims=True)
        e = jnp.exp(s)
        p = e * pl.reciprocal(jnp.sum(e, axis=-1, keepdims=True), approx=True)
        outs.append(jnp.dot(p.astype(vh.dtype), vh,
                            preferred_element_type=jnp.float32))
    o_ref[0] = jnp.concatenate(outs, axis=-1).astype(o_ref.dtype)
    # TODO(synk): flash-style KV tiling for very long sequences (full (N, N)
    # score matrices per head are fine for ViT-scale N but not for N >> 1k).


def attention_core(q, k, v, *, num_heads, scale):
    B, N, C = q.shape
    hd = C // num_heads
    spec = pl.BlockSpec((1, N, C), lambda i: (i, 0, 0))
    return pl.pallas_call(
        partial(_attention_kernel, scale=scale, num_heads=num_heads, head_dim=hd),
        out_shape=jax.ShapeDtypeStruct((B, N, C), q.dtype),
        grid=(B,),
        in_specs=[spec, spec, spec],
        out_specs=spec,
        compiler_params=pltpu.CompilerParams(dimension_semantics=("parallel",)),
    )(q, k, v)


# ------------- linear with fused residual + per-sample DropPath --------------

def _linear_residual_kernel(a_ref, w_ref, b_ref, skip_ref, m_ref, o_ref):
    # out = skip + mask * (a @ w + b), epilogue math in f32, single cast at store.
    r = jnp.dot(a_ref[0], w_ref[...], preferred_element_type=jnp.float32)
    r = r + b_ref[...].astype(jnp.float32)
    out = skip_ref[0].astype(jnp.float32) + m_ref[0].astype(jnp.float32) * r
    o_ref[0] = out.astype(o_ref.dtype)


def linear_residual_droppath(a, w, bias, skip, mask):
    B, N, K = a.shape
    Kw, Cout = w.shape
    assert K == Kw and skip.shape == (B, N, Cout)
    spec_in = pl.BlockSpec((1, N, K), lambda i: (i, 0, 0))
    spec_out = pl.BlockSpec((1, N, Cout), lambda i: (i, 0, 0))
    return pl.pallas_call(
        _linear_residual_kernel,
        out_shape=jax.ShapeDtypeStruct((B, N, Cout), skip.dtype),
        grid=(B,),
        in_specs=[spec_in,
                  pl.BlockSpec((K, Cout), lambda i: (0, 0)),
                  pl.BlockSpec((1, Cout), lambda i: (0, 0)),
                  spec_out,
                  pl.BlockSpec((1, 1, 1), lambda i: (i, 0, 0))],
        out_specs=spec_out,
        compiler_params=pltpu.CompilerParams(dimension_semantics=("parallel",)),
    )(a, w, bias, skip, mask)


# ------------------- fused LayerNorm -> linear -> GELU (fc1) -----------------

def _ln_linear_gelu_kernel(x_ref, g_ref, b_ref, w_ref, bias_ref, o_ref,
                           *, eps, approximate):
    x = x_ref[0].astype(jnp.float32)
    mu = jnp.mean(x, axis=-1, keepdims=True)
    xc = x - mu
    var = jnp.mean(xc * xc, axis=-1, keepdims=True)
    y = xc * jax.lax.rsqrt(var + eps)
    y = y * g_ref[...].astype(jnp.float32) + b_ref[...].astype(jnp.float32)
    r = jnp.dot(y.astype(w_ref.dtype), w_ref[...],
                preferred_element_type=jnp.float32)
    r = r + bias_ref[...].astype(jnp.float32)
    r = jax.nn.gelu(r, approximate=approximate)
    o_ref[0] = r.astype(o_ref.dtype)


def ln_linear_gelu(x, gamma, beta, w, bias, *, eps=1e-5, approximate=False):
    B, N, C = x.shape
    Kw, H = w.shape
    assert Kw == C
    return pl.pallas_call(
        partial(_ln_linear_gelu_kernel, eps=eps, approximate=approximate),
        out_shape=jax.ShapeDtypeStruct((B, N, H), x.dtype),
        grid=(B,),
        in_specs=[pl.BlockSpec((1, N, C), lambda i: (i, 0, 0)),
                  pl.BlockSpec((1, C), lambda i: (0, 0)),
                  pl.BlockSpec((1, C), lambda i: (0, 0)),
                  pl.BlockSpec((C, H), lambda i: (0, 0)),
                  pl.BlockSpec((1, H), lambda i: (0, 0))],
        out_specs=pl.BlockSpec((1, N, H), lambda i: (i, 0, 0)),
        compiler_params=pltpu.CompilerParams(dimension_semantics=("parallel",)),
    )(x, gamma, beta, w, bias)


# --------------------------------- DropPath ----------------------------------

def drop_path_mask(key, batch, *, drop_prob, training, scale_by_keep):
    """Per-sample DropPath mask, shape (B,1,1), f32, plain JAX (no in-kernel PRNG)."""
    if drop_prob == 0.0 or not training:
        return jnp.ones((batch, 1, 1), jnp.float32)
    keep_prob = 1.0 - drop_prob
    keep = jax.random.bernoulli(key, p=keep_prob, shape=(batch,)).astype(jnp.float32)
    if scale_by_keep:
        keep = keep / keep_prob
    return keep.reshape(batch, 1, 1)


# ----------------------------------- Block -----------------------------------

class Block:
    """JAX/Pallas mirror of the ViT Block (pre-norm attention + MLP, DropPath residuals)."""

    def __init__(self, dim, num_heads, mlp_ratio=4.0, qkv_bias=False,
                 drop=0.0, attn_drop=0.0, vit_drop_path=0.0, scale_by_keep=True,
                 *, param_key, dtype=jnp.float32, gelu_approximate=False):
        # TODO(synk): attn_drop / proj_drop / MLP Dropout with p > 0 in training
        # mode are not implemented (the reference module defaults them to 0.0).
        assert drop == 0.0 and attn_drop == 0.0
        self.dim = dim
        self.num_heads = num_heads
        self.head_dim = dim // num_heads
        self.scale = self.head_dim ** -0.5
        self.drop_path_prob = float(vit_drop_path)
        self.scale_by_keep = scale_by_keep
        self.gelu_approximate = gelu_approximate   # False == PyTorch exact-erf GELU
        self.training = True
        hidden = int(dim * mlp_ratio)

        ks = jax.random.split(param_key, 7)
        std = 0.02

        def init(k, shape):
            return (std * jax.random.normal(k, shape)).astype(dtype)

        self.params = dict(
            ln1_g=jnp.ones((1, dim), dtype), ln1_b=jnp.zeros((1, dim), dtype),
            ln2_g=jnp.ones((1, dim), dtype), ln2_b=jnp.zeros((1, dim), dtype),
            w_qkv=init(ks[0], (dim, 3 * dim)),
            b_qkv=(init(ks[1], (1, 3 * dim)) if qkv_bias
                   else jnp.zeros((1, 3 * dim), dtype)),
            w_proj=init(ks[2], (dim, dim)),
            b_proj=init(ks[3], (1, dim)),
            w_fc1=init(ks[4], (dim, hidden)),
            b_fc1=init(ks[5], (1, hidden)),
            w_fc2=init(ks[6], (hidden, dim)),
            b_fc2=jnp.zeros((1, dim), dtype),
        )

    def __call__(self, x, mask1=None, mask2=None, *, rng_key=None):
        B, N, C = x.shape
        p = self.params

        if mask1 is None or mask2 is None:
            if rng_key is None:
                rng_key = jax.random.PRNGKey(0)
            k1, k2 = jax.random.split(rng_key)
            mk = partial(drop_path_mask, drop_prob=self.drop_path_prob,
                         training=self.training, scale_by_keep=self.scale_by_keep)
            mask1 = mk(k1, B)
            mask2 = mk(k2, B)

        # Weight-sized slices (cheap next to activation traffic); keeps the
        # param layout identical to PyTorch's fused qkv Linear.
        wq, wk, wv = p["w_qkv"][:, :C], p["w_qkv"][:, C:2 * C], p["w_qkv"][:, 2 * C:]
        bq, bk, bv = p["b_qkv"][:, :C], p["b_qkv"][:, C:2 * C], p["b_qkv"][:, 2 * C:]

        # --- attention branch (LN1 fused into QKV; residual fused into proj) ---
        q, k, v = ln_qkv(x, p["ln1_g"], p["ln1_b"], wq, wk, wv, bq, bk, bv)
        a = attention_core(q, k, v, num_heads=self.num_heads, scale=self.scale)
        x = linear_residual_droppath(a, p["w_proj"], p["b_proj"], x, mask1)

        # --- MLP branch (LN2 fused into fc1+GELU; residual fused into fc2) ---
        h = ln_linear_gelu(x, p["ln2_g"], p["ln2_b"], p["w_fc1"], p["b_fc1"],
                           approximate=self.gelu_approximate)
        x = linear_residual_droppath(h, p["w_fc2"], p["b_fc2"], x, mask2)
        return x


# ------------------------------ Pure-JAX reference ---------------------------

def reference_block(params, x, mask1, mask2, *, num_heads, eps=1e-5):
    B, N, C = x.shape
    H = num_heads
    hd = C // H

    def ln(z, g, b):
        mu = jnp.mean(z, axis=-1, keepdims=True)
        var = jnp.mean((z - mu) ** 2, axis=-1, keepdims=True)
        return (z - mu) * jax.lax.rsqrt(var + eps) * g.reshape(-1) + b.reshape(-1)

    h = ln(x, params["ln1_g"], params["ln1_b"])
    qkv = h @ params["w_qkv"] + params["b_qkv"].reshape(-1)
    qkv = qkv.reshape(B, N, 3, H, hd).transpose(2, 0, 3, 1, 4)
    q, k, v = qkv[0], qkv[1], qkv[2]
    attn = (q @ jnp.swapaxes(k, -2, -1)) * (hd ** -0.5)
    attn = jax.nn.softmax(attn, axis=-1)
    a = (attn @ v).transpose(0, 2, 1, 3).reshape(B, N, C)
    a = a @ params["w_proj"] + params["b_proj"].reshape(-1)
    x = x + a * mask1
    h2 = ln(x, params["ln2_g"], params["ln2_b"])
    m = jax.nn.gelu(h2 @ params["w_fc1"] + params["b_fc1"].reshape(-1), approximate=False)
    m = m @ params["w_fc2"] + params["b_fc2"].reshape(-1)
    return x + m * mask2


if __name__ == "__main__":
    key = jax.random.PRNGKey(0)
    kx, kp, kd = jax.random.split(key, 3)

    B, N, dim, heads = 2, 8, 32, 4
    x = jax.random.normal(kx, (B, N, dim), dtype=jnp.float32)

    block = Block(dim, heads, mlp_ratio=4.0, qkv_bias=False,
                  vit_drop_path=0.25, param_key=kp)

    # Training-mode DropPath masks (shared with the reference for the check).
    k1, k2 = jax.random.split(kd)
    mask1 = drop_path_mask(k1, B, drop_prob=block.drop_path_prob, training=True,
                           scale_by_keep=True)
    mask2 = drop_path_mask(k2, B, drop_prob=block.drop_path_prob, training=True,
                           scale_by_keep=True)

    y = jax.block_until_ready(block(x, mask1, mask2))
    y_ref = reference_block(block.params, x, mask1, mask2, num_heads=heads)
    assert y.shape == x.shape
    assert jnp.allclose(y, y_ref, rtol=1e-2, atol=1e-3), \
        f"max abs err {float(jnp.max(jnp.abs(y - y_ref)))}"

    # Eval mode: DropPath is the identity (masks of ones).
    block.training = False
    y_eval = jax.block_until_ready(block(x, rng_key=jax.random.PRNGKey(1)))
    ones = jnp.ones((B, 1, 1), jnp.float32)
    y_eval_ref = reference_block(block.params, x, ones, ones, num_heads=heads)
    assert jnp.allclose(y_eval, y_eval_ref, rtol=1e-2, atol=1e-3)

    print("KERNEL_OK")
</pallas_src>

<mosaic_0001>
module attributes {stable_mosaic.version = 11 : i64} {
  func.func @_ln_qkv_kernel(%arg0: i32, %arg1: memref<1x8x32xf32, #tpu.memory_space<vmem>>, %arg2: memref<1x32xf32, #tpu.memory_space<vmem>>, %arg3: memref<1x32xf32, #tpu.memory_space<vmem>>, %arg4: memref<32x32xf32, #tpu.memory_space<vmem>>, %arg5: memref<32x32xf32, #tpu.memory_space<vmem>>, %arg6: memref<32x32xf32, #tpu.memory_space<vmem>>, %arg7: memref<1x32xf32, #tpu.memory_space<vmem>>, %arg8: memref<1x32xf32, #tpu.memory_space<vmem>>, %arg9: memref<1x32xf32, #tpu.memory_space<vmem>>, %arg10: memref<1x8x32xf32, #tpu.memory_space<vmem>>, %arg11: memref<1x8x32xf32, #tpu.memory_space<vmem>>, %arg12: memref<1x8x32xf32, #tpu.memory_space<vmem>>) attributes {dimension_semantics = [#tpu.dimension_semantics<parallel>], iteration_bounds = array<i64: 2>, scalar_prefetch = 0 : i64, scratch_operands = 0 : i64, tpu.core_type = #tpu.core_type<tc>, window_params = [{transform_indices = @transform_0, window_bounds = array<i64: 1, 8, 32>}, {pipeline_mode = #tpu.pipeline_mode<synchronous>, transform_indices = @transform_1, window_bounds = array<i64: 1, 32>}, {pipeline_mode = #tpu.pipeline_mode<synchronous>, transform_indices = @transform_2, window_bounds = array<i64: 1, 32>}, {pipeline_mode = #tpu.pipeline_mode<synchronous>, transform_indices = @transform_3, window_bounds = array<i64: 32, 32>}, {pipeline_mode = #tpu.pipeline_mode<synchronous>, transform_indices = @transform_4, window_bounds = array<i64: 32, 32>}, {pipeline_mode = #tpu.pipeline_mode<synchronous>, transform_indices = @transform_5, window_bounds = array<i64: 32, 32>}, {pipeline_mode = #tpu.pipeline_mode<synchronous>, transform_indices = @transform_6, window_bounds = array<i64: 1, 32>}, {pipeline_mode = #tpu.pipeline_mode<synchronous>, transform_indices = @transform_7, window_bounds = array<i64: 1, 32>}, {pipeline_mode = #tpu.pipeline_mode<synchronous>, transform_indices = @transform_8, window_bounds = array<i64: 1, 32>}, {transform_indices = @transform_9, window_bounds = array<i64: 1, 8, 32>}, {transform_indices = @transform_10, window_bounds = array<i64: 1, 8, 32>}, {transform_indices = @transform_11, window_bounds = array<i64: 1, 8, 32>}]} {
    %c0 = arith.constant 0 : index
    %c0_0 = arith.constant 0 : index
    %c0_1 = arith.constant 0 : index
    %0 = vector.load %arg1[%c0, %c0_0, %c0_1] : memref<1x8x32xf32, #tpu.memory_space<vmem>>, vector<1x8x32xf32>
    %1 = vector.shape_cast %0 : vector<1x8x32xf32> to vector<8x32xf32>
    %cst = arith.constant dense<0.000000e+00> : vector<8xf32>
    %2 = vector.multi_reduction <add>, %1, %cst [1] : vector<8x32xf32> to vector<8xf32>
    %3 = vector.shape_cast %2 : vector<8xf32> to vector<8x1xf32>
    %cst_2 = arith.constant 3.200000e+01 : f32
    %4 = vector.broadcast %cst_2 : f32 to vector<8x1xf32>
    %5 = arith.divf %3, %4 : vector<8x1xf32>
    %6 = vector.broadcast %5 : vector<8x1xf32> to vector<8x32xf32>
    %7 = arith.subf %1, %6 : vector<8x32xf32>
    %8 = arith.mulf %7, %7 : vector<8x32xf32>
    %cst_3 = arith.constant dense<0.000000e+00> : vector<8xf32>
    %9 = vector.multi_reduction <add>, %8, %cst_3 [1] : vector<8x32xf32> to vector<8xf32>
    %10 = vector.shape_cast %9 : vector<8xf32> to vector<8x1xf32>
    %cst_4 = arith.constant 3.200000e+01 : f32
    %11 = vector.broadcast %cst_4 : f32 to vector<8x1xf32>
    %12 = arith.divf %10, %11 : vector<8x1xf32>
    %cst_5 = arith.constant 9.99999974E-6 : f32
    %13 = vector.broadcast %cst_5 : f32 to vector<8x1xf32>
    %14 = arith.addf %12, %13 : vector<8x1xf32>
    %15 = math.rsqrt %14 : vector<8x1xf32>
    %16 = vector.broadcast %15 : vector<8x1xf32> to vector<8x32xf32>
    %17 = arith.mulf %7, %16 : vector<8x32xf32>
    %c0_6 = arith.constant 0 : index
    %c0_7 = arith.constant 0 : index
    %18 = vector.load %arg2[%c0_6, %c0_7] : memref<1x32xf32, #tpu.memory_space<vmem>>, vector<1x32xf32>
    %19 = vector.broadcast %18 : vector<1x32xf32> to vector<8x32xf32>
    %20 = arith.mulf %17, %19 : vector<8x32xf32>
    %c0_8 = arith.constant 0 : index
    %c0_9 = arith.constant 0 : index
    %21 = vector.load %arg3[%c0_8, %c0_9] : memref<1x32xf32, #tpu.memory_space<vmem>>, vector<1x32xf32>
    %22 = vector.broadcast %21 : vector<1x32xf32> to vector<8x32xf32>
    %23 = arith.addf %20, %22 : vector<8x32xf32>
    %c0_10 = arith.constant 0 : index
    %c0_11 = arith.constant 0 : index
    %24 = vector.load %arg4[%c0_10, %c0_11] : memref<32x32xf32, #tpu.memory_space<vmem>>, vector<32x32xf32>
    %cst_12 = arith.constant dense<0.000000e+00> : vector<8x32xf32>
    %25 = tpu.matmul %23, %24, %cst_12 {dimension_numbers = #tpu.dot_dimension_numbers<[1], [0], [0], [1], [0, 0, 1, 1], [], []>} : vector<8x32xf32>, vector<32x32xf32>, vector<8x32xf32> -> vector<8x32xf32>
    %c0_13 = arith.constant 0 : index
    %c0_14 = arith.constant 0 : index
    %26 = vector.load %arg5[%c0_13, %c0_14] : memref<32x32xf32, #tpu.memory_space<vmem>>, vector<32x32xf32>
    %cst_15 = arith.constant dense<0.000000e+00> : vector<8x32xf32>
    %27 = tpu.matmul %23, %26, %cst_15 {dimension_numbers = #tpu.dot_dimension_numbers<[1], [0], [0], [1], [0, 0, 1, 1], [], []>} : vector<8x32xf32>, vector<32x32xf32>, vector<8x32xf32> -> vector<8x32xf32>
    %c0_16 = arith.constant 0 : index
    %c0_17 = arith.constant 0 : index
    %28 = vector.load %arg6[%c0_16, %c0_17] : memref<32x32xf32, #tpu.memory_space<vmem>>, vector<32x32xf32>
    %cst_18 = arith.constant dense<0.000000e+00> : vector<8x32xf32>
    %29 = tpu.matmul %23, %28, %cst_18 {dimension_numbers = #tpu.dot_dimension_numbers<[1], [0], [0], [1], [0, 0, 1, 1], [], []>} : vector<8x32xf32>, vector<32x32xf32>, vector<8x32xf32> -> vector<8x32xf32>
    %c0_19 = arith.constant 0 : index
    %c0_20 = arith.constant 0 : index
    %30 = vector.load %arg7[%c0_19, %c0_20] : memref<1x32xf32, #tpu.memory_space<vmem>>, vector<1x32xf32>
    %31 = vector.broadcast %30 : vector<1x32xf32> to vector<8x32xf32>
    %32 = arith.addf %25, %31 : vector<8x32xf32>
    %c0_21 = arith.constant 0 : index
    %c0_22 = arith.constant 0 : index
    %c0_23 = arith.constant 0 : index
    %33 = vector.load %arg10[%c0_21, %c0_22, %c0_23] : memref<1x8x32xf32, #tpu.memory_space<vmem>>, vector<1x8x32xf32>
    %34 = vector.shape_cast %33 : vector<1x8x32xf32> to vector<8x32xf32>
    %35 = vector.shape_cast %32 : vector<8x32xf32> to vector<1x8x32xf32>
    tpu.vector_store %arg10[%c0_21, %c0_22, %c0_23], %35 {strides = array<i32>} : memref<1x8x32xf32, #tpu.memory_space<vmem>>, vector<1x8x32xf32>,
    %c0_24 = arith.constant 0 : index
    %c0_25 = arith.constant 0 : index
    %36 = vector.load %arg8[%c0_24, %c0_25] : memref<1x32xf32, #tpu.memory_space<vmem>>, vector<1x32xf32>
    %37 = vector.broadcast %36 : vector<1x32xf32> to vector<8x32xf32>
    %38 = arith.addf %27, %37 : vector<8x32xf32>
    %c0_26 = arith.constant 0 : index
    %c0_27 = arith.constant 0 : index
    %c0_28 = arith.constant 0 : index
    %39 = vector.load %arg11[%c0_26, %c0_27, %c0_28] : memref<1x8x32xf32, #tpu.memory_space<vmem>>, vector<1x8x32xf32>
    %40 = vector.shape_cast %39 : vector<1x8x32xf32> to vector<8x32xf32>
    %41 = vector.shape_cast %38 : vector<8x32xf32> to vector<1x8x32xf32>
    tpu.vector_store %arg11[%c0_26, %c0_27, %c0_28], %41 {strides = array<i32>} : memref<1x8x32xf32, #tpu.memory_space<vmem>>, vector<1x8x32xf32>,
    %c0_29 = arith.constant 0 : index
    %c0_30 = arith.constant 0 : index
    %42 = vector.load %arg9[%c0_29, %c0_30] : memref<1x32xf32, #tpu.memory_space<vmem>>, vector<1x32xf32>
    %43 = vector.broadcast %42 : vector<1x32xf32> to vector<8x32xf32>
    %44 = arith.addf %29, %43 : vector<8x32xf32>
    %c0_31 = arith.constant 0 : index
    %c0_32 = arith.constant 0 : index
    %c0_33 = arith.constant 0 : index
    %45 = vector.load %arg12[%c0_31, %c0_32, %c0_33] : memref<1x8x32xf32, #tpu.memory_space<vmem>>, vector<1x8x32xf32>
    %46 = vector.shape_cast %45 : vector<1x8x32xf32> to vector<8x32xf32>
    %47 = vector.shape_cast %44 : vector<8x32xf32> to vector<1x8x32xf32>
    tpu.vector_store %arg12[%c0_31, %c0_32, %c0_33], %47 {strides = array<i32>} : memref<1x8x32xf32, #tpu.memory_space<vmem>>, vector<1x8x32xf32>,
    return
  }
  func.func @transform_0(%arg0: i32) -> (i32, i32, i32) {
    %c0_i32 = arith.constant 0 : i32
    %c0_i32_0 = arith.constant 0 : i32
    %c0_i32_1 = arith.constant 0 : i32
    return %arg0, %c0_i32, %c0_i32_0 : i32, i32, i32
  }
  func.func @transform_1(%arg0: i32) -> (i32, i32) {
    %c0_i32 = arith.constant 0 : i32
    %c0_i32_0 = arith.constant 0 : i32
    %c0_i32_1 = arith.constant 0 : i32
    return %c0_i32, %c0_i32_0 : i32, i32
  }
  func.func @transform_2(%arg0: i32) -> (i32, i32) {
    %c0_i32 = arith.constant 0 : i32
    %c0_i32_0 = arith.constant 0 : i32
    %c0_i32_1 = arith.constant 0 : i32
    return %c0_i32, %c0_i32_0 : i32, i32
  }
  func.func @transform_3(%arg0: i32) -> (i32, i32) {
    %c0_i32 = arith.constant 0 : i32
    %c0_i32_0 = arith.constant 0 : i32
    %c0_i32_1 = arith.constant 0 : i32
    return %c0_i32, %c0_i32_0 : i32, i32
  }
  func.func @transform_4(%arg0: i32) -> (i32, i32) {
    %c0_i32 = arith.constant 0 : i32
    %c0_i32_0 = arith.constant 0 : i32
    %c0_i32_1 = arith.constant 0 : i32
    return %c0_i32, %c0_i32_0 : i32, i32
  }
  func.func @transform_5(%arg0: i32) -> (i32, i32) {
    %c0_i32 = arith.constant 0 : i32
    %c0_i32_0 = arith.constant 0 : i32
    %c0_i32_1 = arith.constant 0 : i32
    return %c0_i32, %c0_i32_0 : i32, i32
  }
  func.func @transform_6(%arg0: i32) -> (i32, i32) {
    %c0_i32 = arith.constant 0 : i32
    %c0_i32_0 = arith.constant 0 : i32
    %c0_i32_1 = arith.constant 0 : i32
    return %c0_i32, %c0_i32_0 : i32, i32
  }
  func.func @transform_7(%arg0: i32) -> (i32, i32) {
    %c0_i32 = arith.constant 0 : i32
    %c0_i32_0 = arith.constant 0 : i32
    %c0_i32_1 = arith.constant 0 : i32
    return %c0_i32, %c0_i32_0 : i32, i32
  }
  func.func @transform_8(%arg0: i32) -> (i32, i32) {
    %c0_i32 = arith.constant 0 : i32
    %c0_i32_0 = arith.constant 0 : i32
    %c0_i32_1 = arith.constant 0 : i32
    return %c0_i32, %c0_i32_0 : i32, i32
  }
  func.func @transform_9(%arg0: i32) -> (i32, i32, i32) {
    %c0_i32 = arith.constant 0 : i32
    %c0_i32_0 = arith.constant 0 : i32
    %c0_i32_1 = arith.constant 0 : i32
    return %arg0, %c0_i32, %c0_i32_0 : i32, i32, i32
  }
  func.func @transform_10(%arg0: i32) -> (i32, i32, i32) {
    %c0_i32 = arith.constant 0 : i32
    %c0_i32_0 = arith.constant 0 : i32
    %c0_i32_1 = arith.constant 0 : i32
    return %arg0, %c0_i32, %c0_i32_0 : i32, i32, i32
  }
  func.func @transform_11(%arg0: i32) -> (i32, i32, i32) {
    %c0_i32 = arith.constant 0 : i32
    %c0_i32_0 = arith.constant 0 : i32
    %c0_i32_1 = arith.constant 0 : i32
    return %arg0, %c0_i32, %c0_i32_0 : i32, i32, i32
  }
}

</mosaic_0001>

<bundles_post_ra>
// kernel: tpu_custom_call.1
= control target key start
LH: loop header
LB: loop body
LE: loop exit
PB: predicated region body
PF: predicated region fallthrough
CT: control target
= control target key end

     0   :  { %s1828_s0 = inlined_call_operand.hbm [shape: f32[2,8,32], index: 0, kind: input, shape index: {}]   ;;  %s1829_s1 = inlined_call_operand.vmem [shape: f32[1,32], index: 1, kind: input, shape index: {}]   ;;  %s1830_s2 = inlined_call_operand.vmem [shape: f32[1,32], index: 2, kind: input, shape index: {}]   ;;  %s1831_s3 = inlined_call_operand.hbm [shape: f32[32,32], index: 3, kind: input, shape index: {}]   ;;  %s1832_s4 = inlined_call_operand.hbm [shape: f32[32,32], index: 4, kind: input, shape index: {}]   ;;  %s1833_s5 = inlined_call_operand.hbm [shape: f32[32,32], index: 5, kind: input, shape index: {}]   ;;  %s1834_s6 = inlined_call_operand.vmem [shape: f32[1,32], index: 6, kind: input, shape index: {}]   ;;  %s1835_s7 = inlined_call_operand.vmem [shape: f32[1,32], index: 7, kind: input, shape index: {}]   ;;  %s1836_s8 = inlined_call_operand.vmem [shape: f32[1,32], index: 8, kind: input, shape index: {}]   ;;  %s1837_s9 = inlined_call_operand.hbm [shape: f32[2,8,32], index: 9, kind: output, shape index: {0}]   ;;  %s1838_s10 = inlined_call_operand.hbm [shape: f32[2,8,32], index: 10, kind: output, shape index: {1}]   ;;  %s1839_s11 = inlined_call_operand.hbm [shape: f32[2,8,32], index: 11, kind: output, shape index: {2}]  }
   0x1   :  { %1848 = sst [smem:[#allocation21_spill]] %s1828_s0 }
   0x2   :  { %1849 = sst [smem:[#allocation22_spill]] %s1836_s8 }
   0x3   :  { %1850 = sst [smem:[#allocation23_spill]] %s1837_s9 }
   0x4   :  { %1851 = sst [smem:[#allocation24_spill]] %s1839_s11 }
   0x5   :  { %17 = vsyncpa [#allocation3], 0 }
   0x6   :  { %19 = vsyncpa [#allocation3 + $0x1], 0 }
   0x7   :  { %20 = vsyncpa [#allocation6], 0 }
   0x8   :  { %21 = vsyncpa [#allocation9], 0 }
   0x9   :  { %22 = vsyncpa [#allocation4], 0 }
   0xa   :  { %24 = vsyncpa [#allocation4 + $0x1], 0 }
   0xb   :  { %25 = vsyncpa [#allocation12], 0 }
   0xc   :  { %27 = vsyncpa [#allocation12 + $0x1], 0  ;;  %s1469_s17 = smov 0   ;;  %s1471_s18 = smov 0  }
   0xd   :  { %s1473_s19 = smov 0   ;;  %s1475_s20 = smov 0  }
   0xe LB: > { %1852 = sst [smem:[#allocation19_spill]] %s1383_s17  ;;  %s1490_s21 = sadd.s32 4294967295, %s1395_s20   ;;  %s1395_s20 = sphi %s1475_s20, %s1880_s20   ;;  %s1391_s19 = sphi %s1473_s19, %s1879_s19   ;;  %s1387_s18 = sphi %s1471_s18, %s1878_s18   ;;  %s1383_s17 = sphi %s1469_s17, %s1877_s17  }
   0xf   : > { %s1840_s22 = sadd.s32 4294967294, %s1395_s20   ;;  %p53_p0 = scmp.ne.s32.totalorder %s1387_s18, %s1383_s17 }
  0x10   : > { %p1842_p1 = scmp.eq.s32.totalorder %s1490_s21, 0  ;;  %p251_p3 = scmp.eq.s32.totalorder %s1840_s22, 1 }
  0x11   : > { %p956_p5 = scmp.ge.s32.totalorder %s1395_s20, 1  ;;  %p310_p7 = scmp.lt.s32.totalorder %s1395_s20, 3 }
  0x12   : > { %p1501_p4 = por %p1842_p1, %p53_p0  ;;  %p1506_p6 = por %p251_p3, %p53_p0 }
  0x13   : > { %p1511_p8 = pnand %p956_p5, %p310_p7  ;;  %s1397_s26 = smov [#allocation5]  }
  0x14   : > { %s1853_s23 = scalar_select %p1501_p4, 1, 0 }
  0x15   : > { %s1854_s24 = scalar_select %p1506_p6, 1, 0 }
  0x16   : > { %s1856_s25 = scalar_select %p1511_p8, 1, 0 }
  0x17   : > { %1855 = sst [smem:[#allocation20_spill]] %s1854_s24  ;;  %s328_s27 = sshll.u32 %s1397_s26, 4  ;;  %s1515_s27 = int_to_ptr.vmem [resolvable:$true] %s328_s27 }
  0x18   : > { %p1073_p9 = pneg %p1511_p8  ;;  %s1398_s29 = smov [#allocation7]  }
  0x19   : > { %s341_s30 = sshll.u32 %s1398_s29, 4  ;;  %s1399_s12 = smov [#allocation8]   ;;  %s1526_s30 = int_to_ptr.vmem [resolvable:$true] %s341_s30 }
  0x1a   : > { %p1522_p11 = pnand %p1073_p9, %p1842_p1  ;;  %s1528_s13 = sshll.u32 %s1399_s12, 4  ;;  %s355_s13 = int_to_ptr.vmem [resolvable:$true] %s1528_s13 }
  0x1b   : > { %s1147_s16 = scalar_lea.hbm %s1831_s3, 512 }
  0x1c   : > { %p1148_p12 = scmp.ne.s32.totalorder %s1831_s3, %s1147_s16  ;;  %p1538_p13 = pneg %p1522_p11 }
  0x1d   : > { %p1154_p5 = scmp.lt.u32.totalorder %s1147_s16, %s1831_s3 }
  0x1e   : > { %p1150_p0 = pnand %p1538_p13, %p1148_p12 }
  0x20   : > { %p1151_p3 = pneg %p1150_p0 }
  0x22   : > { %p1156_p7 = pnand %p1154_p5, %p1151_p3 }
  0x24   : > { %1159 = shalt.err (!%p1156_p7)
}
  0x25   : > { %s1160_s22 = scalar_lea.vmem %s1515_s27, 512  ;;  %p1168_p2 = scmp.lt.s32.totalorder %s1515_s27, %s1515_s27 }
  0x26   : > { %p1161_p9 = scmp.ne.s32.totalorder %s1515_s27, %s1160_s22  ;;  %p1169_p6 = scmp.lt.s32.totalorder %s1160_s22, %s1160_s22 }
  0x28   : > { %p1163_p10 = pnand %p1161_p9, %p1538_p13  ;;  %p1170_p12 = por %p1169_p6, %p1168_p2 }
  0x2a   : > { %p1164_p1 = pneg %p1163_p10 }
  0x2c   : > { %p1171_p0 = pnand %p1170_p12, %p1164_p1 }
  0x2e   : > { %1174 = shalt.err (!%p1171_p0)
}
  0x2f   : > { %s1400_s14 = smov 128   ;;  %s1401_s15 = smov 8  }
  0x30   : > { %1076 = dma.hbm_to_vmem [thread:$0]  (!%p1522_p11), %s1831_s3, 512, %s1515_s27, [#allocation6], %s1400_s14, %s1400_s14, %s1401_s15  }
  0x31   : > { %s1175_s22 = scalar_lea.hbm %s1832_s4, 512 }
  0x32   : > { %p1176_p1 = scmp.ne.s32.totalorder %s1832_s4, %s1175_s22  ;;  %p1182_p10 = scmp.lt.u32.totalorder %s1175_s22, %s1832_s4 }
  0x34   : > { %p1178_p2 = pnand %p1176_p1, %p1538_p13 }
  0x36   : > { %p1179_p6 = pneg %p1178_p2 }
  0x38   : > { %p1184_p3 = pnand %p1182_p10, %p1179_p6 }
  0x3a   : > { %1187 = shalt.err (!%p1184_p3)
}
  0x3b   : > { %s1188_s27 = scalar_lea.vmem %s1526_s30, 512  ;;  %p1196_p12 = scmp.lt.s32.totalorder %s1526_s30, %s1526_s30 }
  0x3c   : > { %p1189_p5 = scmp.ne.s32.totalorder %s1526_s30, %s1188_s27  ;;  %p1197_p0 = scmp.lt.s32.totalorder %s1188_s27, %s1188_s27 }
  0x3e   : > { %p1191_p7 = pnand %p1189_p5, %p1538_p13  ;;  %p1198_p1 = por %p1197_p0, %p1196_p12 }
  0x40   : > { %p1192_p9 = pneg %p1191_p7 }
  0x42   : > { %p1199_p2 = pnand %p1198_p1, %p1192_p9 }
  0x44   : > { %1202 = shalt.err (!%p1199_p2)
}
  0x45   : > { %1079 = dma.hbm_to_vmem [thread:$0]  (!%p1522_p11), %s1832_s4, 512, %s1526_s30, [#allocation6], %s1400_s14, %s1400_s14, %s1401_s15  }
  0x46   : > { %s1203_s16 = scalar_lea.hbm %s1833_s5, 512 }
  0x47   : > { %p1204_p6 = scmp.ne.s32.totalorder %s1833_s5, %s1203_s16  ;;  %p1210_p5 = scmp.lt.u32.totalorder %s1203_s16, %s1833_s5 }
  0x49   : > { %p1206_p10 = pnand %p1204_p6, %p1538_p13 }
  0x4b   : > { %p1207_p3 = pneg %p1206_p10 }
  0x4d   : > { %p1212_p7 = pnand %p1210_p5, %p1207_p3 }
  0x4f   : > { %1215 = shalt.err (!%p1212_p7)
}
  0x50   : > { %s1216_s27 = scalar_lea.vmem %s355_s13, 512  ;;  %p1224_p1 = scmp.lt.s32.totalorder %s355_s13, %s355_s13 }
  0x51   : > { %p1217_p9 = scmp.ne.s32.totalorder %s355_s13, %s1216_s27  ;;  %p1225_p2 = scmp.lt.s32.totalorder %s1216_s27, %s1216_s27 }
  0x53   : > { %p1219_p12 = pnand %p1217_p9, %p1538_p13  ;;  %p1226_p4 = por %p1225_p2, %p1224_p1 }
  0x55   : > { %p1220_p0 = pneg %p1219_p12 }
  0x57   : > { %p1227_p8 = pnand %p1226_p4, %p1220_p0 }
  0x59   : > { %1230 = shalt.err (!%p1227_p8)
}
  0x5a   : > { %1082 = dma.hbm_to_vmem [thread:$0]  (!%p1522_p11), %s1833_s5, 512, %s355_s13, [#allocation9], %s1400_s14, %s1400_s14, %s1401_s15  }
  0x5b   : > { %s1611_s24 = sadd.s32 1, %s1395_s20   ;;  %s40_s9 = sadd.s32 1, %s1391_s19 }
  0x5c   : > { %s37_s28 = ssub.s32 %s1395_s20, %s1611_s24  ;;  %p47_p8 = scmp.ne.s32.totalorder %s1391_s19, %s1387_s18 }
  0x5d   : > { %p38_p4 = scmp.eq.s32.totalorder %s37_s28, 0  ;;  %p48_p13 = scmp.eq.s32.totalorder %s1395_s20, 0 }
  0x5e   : > { %p1100_p6 = scmp.lt.s32.totalorder %s1395_s20, 2  ;;  %p1859_p3 = scmp.eq.s32.totalorder %s1490_s21, 1 }
  0x5f   : > { %s1621_s11 = scalar_select %p38_p4, %s1391_s19, %s40_s9  }
  0x60   : > { %p49_p10 = por %p48_p13, %p47_p8  ;;  %p1625_p5 = por %p1859_p3, %p47_p8 }
  0x61   : > { %s377_s16 = sand.u32 1, %s1391_s19   ;;  %s962_s26 = sshll.u32 %s1395_s20, 7 }
  0x62   : > { %s961_s13 = sshll.u32 %s377_s16, 3  ;;  %s1861_s0 = sld [smem:[#allocation21_spill]] }
  0x63   : > { %s381_s12 = scalar_lea.vmem [#allocation2], %s961_s13  ;;  %p1636_p11 = pnand %p1100_p6, %p49_p10 }
  0x64   : > { %s388_s22 = sshll.u32 %s381_s12, 4  ;;  %s378_s30 = scalar_lea.sflag [#allocation3], %s377_s16  ;;  %s1640_s22 = int_to_ptr.vmem [resolvable:$true] %s388_s22 }
  0x65   : > { %p1233_p9 = pneg %p1636_p11 }
  0x68   : > { %s1634_s29 = scalar_lea.hbm %s1861_s0, %s962_s26  ;;  %s1236_s26 = scalar_lea.hbm %s1861_s0, 256 }
  0x69   : > { %s1231_s8 = scalar_lea.hbm %s1634_s29, 128  ;;  %p1237_p1 = scmp.lt.u32.totalorder %s1634_s29, %s1861_s0 }
  0x6a   : > { %p1232_p7 = scmp.ne.s32.totalorder %s1634_s29, %s1231_s8  ;;  %p1238_p2 = scmp.lt.u32.totalorder %s1236_s26, %s1231_s8 }
  0x6b   : > { %p1240_p8 = scmp.lt.u32.totalorder %s1231_s8, %s1634_s29 }
  0x6c   : > { %p1234_p12 = pnand %p1233_p9, %p1232_p7  ;;  %p1239_p4 = por %p1238_p2, %p1237_p1 }
  0x6e   : > { %p1235_p0 = pneg %p1234_p12  ;;  %p1241_p13 = por %p1240_p8, %p1239_p4 }
  0x70   : > { %p1242_p6 = pnand %p1241_p13, %p1235_p0 }
  0x72   : > { %1245 = shalt.err (!%p1242_p6)
}
  0x73   : > { %s1246_s16 = scalar_lea.vmem %s1640_s22, 128  ;;  %s1402_s15 = smov [#allocation2]  }
  0x74   : > { %p1247_p10 = scmp.ne.s32.totalorder %s1640_s22, %s1246_s16  ;;  %s1251_s12 = sshll.u32 %s1402_s15, 4  ;;  %s1252_s12 = int_to_ptr.vmem [resolvable:$false] %s1251_s12 }
  0x75   : > { %s1253_s28 = scalar_lea.vmem %s1252_s12, 256  ;;  %p1254_p12 = scmp.lt.s32.totalorder %s1640_s22, %s1252_s12 }
  0x76   : > { %p1249_p3 = pnand %p1247_p10, %p1233_p9  ;;  %p1255_p1 = scmp.lt.s32.totalorder %s1253_s28, %s1246_s16 }
  0x78   : > { %p1250_p7 = pneg %p1249_p3  ;;  %p1256_p2 = por %p1255_p1, %p1254_p12 }
  0x7a   : > { %p1257_p4 = pnand %p1256_p2, %p1250_p7 }
  0x7c   : > { %1260 = shalt.err (!%p1257_p4)
}
  0x7d   : > { %1086 = dma.hbm_to_vmem [thread:$0]  (!%p1636_p11), %s1634_s29, 128, %s1640_s22, %s378_s30  }
  0x7e   : > { %p1863_p0 = scmp.ne.s32.totalorder %s1856_s25, 0 }
  0x7f   : > { %s1670_s8 = sand.u32 (!%p1863_p0), 1, %s1387_s18   ;;  %p1864_p9 = scmp.ne.s32.totalorder (!%p1863_p0), %s1853_s23, 0 }
  0x80   : > { %397 = sbr.rel (%p1863_p0) target bundleno = 733 (0x2dd), region = 56  ;;  %s1673_s9 = sshll.u32 (!%p1863_p0), %s1670_s8, 3 }
  0x81   : > { %s400_s26 = scalar_lea.sflag (!%p1863_p0), [#allocation3], %s1670_s8  ;;  %s403_s13 = scalar_lea.vmem (!%p1863_p0), [#allocation2], %s1673_s9 }
  0x87   : > { %1362 = dma.done.wait (%p1864_p9), %s400_s26, 128  }
  0x88   : > { %1364 = vsyncadd (%p1864_p9), %s400_s26, 4294967168  ;;  %p1865_p11 = scmp.eq.s32.totalorder %s1490_s21, 0 }
  0x8a   : > { %1366 = dma.done.wait (%p1865_p11), [#allocation6], 1024   ;;  %p1866_p8 = pmov %p1865_p11 }
  0x8c   : > { %1368 = vsyncadd (%p1866_p8), [#allocation6], 4294966272  ;;  %p1867_p13 = pmov %p1866_p8 }
  0x8d   : > { %p1868_p6 = pmov %p1866_p8 }
  0x8e   : > { %1370 = dma.done.wait (%p1867_p13), [#allocation9], 512  }
  0x8f   : > { %1372 = vsyncadd (%p1868_p6), [#allocation9], 4294966784  ;;  %vm465_vm0 = vcmask 261120   ;;  %v464_v0 = vld [vmem:[%s403_s13] sm:$0xff]  ;;  %v496_v7 = vld [vmem:[#allocation5] sm:$0xff]  ;;  %v1403_v10 = vmov 0.0|0.0  }
  0x90   : > { %v466_v1 = vsel %vm465_vm0, %v464_v0, 0.0  ;;  %v497_v8 = vld [vmem:[#allocation5 + $0x8] sm:$0xff]  ;;  %v500_v9 = vld [vmem:[#allocation7] sm:$0xff]  ;;  %1035 = vmatprep.subr.bf16.mxu0 %v1403_v10  ;;  %1041 = vmatprep.subr.bf16.mxu1 %v1403_v10  ;;  %v498_v13 = vld [vmem:[#allocation5 + $0x10] sm:$0xff]  ;;  %vm1404_vm1 = vmmov 0   ;;  %v1405_v18 = vmov 0.0  }
  0x91   : > { %467 = vadd.xlane.f32.xlu0 %v466_v1  ;;  %v1036_v11 = vpack.c.bf16 %v497_v8, %v496_v7  ;;  %v501_v12 = vld [vmem:[#allocation7 + $0x8] sm:$0xff]  ;;  %v499_v14 = vld [vmem:[#allocation5 + $0x18] sm:$0xff]  ;;  %v502_v16 = vld [vmem:[#allocation7 + $0x10] sm:$0xff]  ;;  %1010 = vmatprep.mubr.msk.f32.mxu0 %vm1404_vm1, %v1405_v18  ;;  %s750_s27 = sand.u32 1, %s1490_s21   ;;  %s1705_s30 = sshll.u32 %s1490_s21, 7 }
  0x92   : > { %v1042_v15 = vpack.c.bf16 %v501_v12, %v500_v9  ;;  %v503_v17 = vld [vmem:[#allocation7 + $0x18] sm:$0xff]  ;;  %1021 = vmatprep.mubr.msk.f32.mxu1 %vm1404_vm1, %v1405_v18  ;;  %v1039_v19 = vpack.c.bf16 %v499_v14, %v498_v13  ;;  %v971_v25 = vld [vmem:[%s1829_s1] ss:$0 sm:$0xff]  ;;  %v504_v27 = vld [vmem:[#allocation8] sm:$0xff]  ;;  %s456_s28 = scalar_lea.vmem [#allocation11], %s1673_s9  ;;  %s449_s13 = scalar_lea.vmem [#allocation10], %s1673_s9 }
  0x93   : > { %1037 = vmatpush3.bf16.msra.mxu0 %v1036_v11  ;;  %v1045_v20 = vpack.c.bf16 %v503_v17, %v502_v16  ;;  %v505_v28 = vld [vmem:[#allocation8 + $0x8] sm:$0xff]  ;;  %v972_v29 = vld [vmem:[%s1830_s2] ss:$0 sm:$0xff]  ;;  %v507_v34 = vld [vmem:[#allocation8 + $0x18] sm:$0xff]  ;;  %s782_s26 = sshll.u32 %s456_s28, 4  ;;  %s769_s23 = sshll.u32 %s449_s13, 4  ;;  %s1721_s26 = int_to_ptr.vmem [resolvable:$true] %s782_s26  ;;  %s1729_s23 = int_to_ptr.vmem [resolvable:$true] %s769_s23 }
  0x94   : > { %1043 = vmatpush3.bf16.msra.mxu1 %v1042_v15  ;;  %1038 = vmatprep.subr.bf16.mxu0 %v1403_v10  ;;  %v1048_v31 = vpack.c.bf16 %v505_v28, %v504_v27  ;;  %v506_v33 = vld [vmem:[#allocation8 + $0x10] sm:$0xff]  ;;  %s1719_s29 = scalar_lea.hbm %s1838_s10, %s1705_s30  ;;  %s1869_s16 = sld [smem:[#allocation23_spill]] }
  0x95   : > { %1044 = vmatprep.subr.bf16.mxu1 %v1403_v10  ;;  %v1051_v35 = vpack.c.bf16 %v507_v34, %v506_v33  ;;  %v973_v36 = vld [vmem:[%s1834_s6] ss:$0 sm:$0xff]  ;;  %s1733_s12 = scalar_lea.sflag [#allocation12], %s750_s27  ;;  %s1261_s25 = scalar_lea.vmem %s1721_s26, 128 }
  0x96   : > { %v975_v37 = vld [vmem:[%s1835_s7] ss:$0 sm:$0xff]  ;;  %p1262_p10 = scmp.ne.s32.totalorder %s1721_s26, %s1261_s25  ;;  %s1406_s21 = smov [#allocation11]  }
  0x97   : > { %1040 = vmatpush3.bf16.msra.mxu0 %v1039_v19  ;;  %s1265_s22 = sshll.u32 %s1406_s21, 4  ;;  %s1266_s22 = int_to_ptr.vmem [resolvable:$false] %s1265_s22 }
  0x98   : > { %1046 = vmatpush3.bf16.msra.mxu1 %v1045_v20  ;;  %1047 = vmatprep.subr.bf16.mxu0 %v1403_v10  ;;  %p1263_p3 = pnand %p1262_p10, %p1625_p5  ;;  %s1267_s14 = scalar_lea.vmem %s1266_s22, 256 }
  0x99   : > { %p1268_p12 = scmp.lt.s32.totalorder %s1721_s26, %s1266_s22  ;;  %p1269_p1 = scmp.lt.s32.totalorder %s1267_s14, %s1261_s25 }
  0x9a   : > { %s1727_s15 = scalar_lea.hbm %s1869_s16, %s1705_s30  ;;  %p1264_p7 = pneg %p1263_p3 }
  0x9b   : > { %p1270_p2 = por %p1269_p1, %p1268_p12 }
  0x9d   : > { %p1271_p4 = pnand %p1270_p2, %p1264_p7 }
 0x11e   : > { %v468_v2 = vpop.xlane.xlu0 %467 }
 0x11f   : > { %v470_v3 = vmul.f32 0.03125, %v468_v2 }
 0x121   : > { %v471_v4 = vsub.f32 %v464_v0, %v470_v3 }
 0x123   : > { %v472_v5 = vmul.f32 %v471_v4, %v471_v4 }
 0x125   : > { %v473_v6 = vsel %vm465_vm0, %v472_v5, 0.0 }
 0x126   : > { %474 = vadd.xlane.f32.xlu0 %v473_v6 }
 0x1b3   : > { %v475_v21 = vpop.xlane.xlu0 %474 }
 0x1b4   : > { %v476_v22 = vmul.f32 0.03125, %v475_v21 }
 0x1b6   : > { %v477_v23 = vadd.f32 1e-05, %v476_v22 }
 0x1b8   : > { %1145 = vrsqrt.f32 %v477_v23 }
 0x1c2   : > { %v1146_v24 = vpop.eup %1145 }
 0x1c3   : > { %v479_v26 = vmul.f32 %v1146_v24, %v471_v4 }
 0x1c5   : > { %v487_v30 = vmul.f32 %v971_v25, %v479_v26 }
 0x1c7   : > { %v495_v32 = vadd.f32 %v972_v29, %v487_v30 }
 0x1c9   : > { %1011 = vmatmul.mubr.msk.f32.vlgmr.msra.gmra.mrb[0].mxu0 %vm465_vm0, %v495_v32  ;;  %1022 = vmatmul.mubr.msk.f32.vlgmr.msra.gmra.mrb[0].mxu1 %vm465_vm0, %v495_v32 }
 0x1ca   : > { %1049 = vmatpush3.bf16.msra.mxu0 %v1048_v31  ;;  %1032 = vmatprep.mubr.msk.f32.mxu0 %vm1404_vm1, %v1405_v18 }
 0x1cb   : > { %1050 = vmatprep.subr.bf16.mxu0 %v1403_v10 }
 0x1ce   : > { %1052 = vmatpush3.bf16.msra.mxu0 %v1051_v35 }
 0x1d1   : > { %1033 = vmatmul.mubr.msk.f32.vlgmr.msra.gmra.mrb[2].mxu0 %vm465_vm0, %v495_v32 }
 0x29c   : > { %v584_v38 = vpop.f32.mrb[0].mxu0  ;;  %v662_v39 = vpop.f32.mrb[0].mxu1 }
 0x29d   : > { %v585_v40 = vadd.f32 %v973_v36, %v584_v38  ;;  %v663_v41 = vadd.f32 %v975_v37, %v662_v39  ;;  %v1012_v42 = vpop.f32.mrb[1].mxu0  ;;  %v1023_v43 = vpop.f32.mrb[1].mxu1 }
 0x29f   : > { %666 = vst.msk [vmem:[%s456_s28] sm:$0xff] %vm465_vm0, %v663_v41  ;;  %588 = vst.msk [vmem:[%s449_s13] sm:$0xff] %vm465_vm0, %v585_v40 }
 0x2a0   : > { %1274 = shalt.err (!%p1271_p4)
}
 0x2a1   : > { %s1275_s27 = scalar_lea.hbm %s1719_s29, 128  ;;  %s1279_s21 = scalar_lea.hbm %s1838_s10, 256 }
 0x2a2   : > { %p1276_p0 = scmp.ne.s32.totalorder %s1719_s29, %s1275_s27  ;;  %p1280_p8 = scmp.lt.u32.totalorder %s1719_s29, %s1838_s10 }
 0x2a3   : > { %p1281_p13 = scmp.lt.u32.totalorder %s1279_s21, %s1275_s27  ;;  %p1283_p10 = scmp.lt.u32.totalorder %s1275_s27, %s1719_s29 }
 0x2a4   : > { %p1277_p9 = pnand %p1276_p0, %p1625_p5 }
 0x2a5   : > { %p1282_p6 = por %p1281_p13, %p1280_p8 }
 0x2a6   : > { %p1278_p11 = pneg %p1277_p9 }
 0x2a7   : > { %p1284_p3 = por %p1283_p10, %p1282_p6 }
 0x2a9   : > { %p1285_p7 = pnand %p1284_p3, %p1278_p11 }
 0x2ab   : > { %1288 = shalt.err (!%p1285_p7)
}
 0x2ac   : > { %1068 = dma.vmem_to_hbm [thread:$0]  (%p1625_p5), %s1721_s26, 128, %s1719_s29, %s1733_s12  }
 0x2ad   : > { %s746_s25 = scalar_lea.sflag [#allocation4], %s1670_s8  ;;  %s1289_s0 = scalar_lea.vmem %s1729_s23, 128 }
 0x2ae   : > { %p1290_p12 = scmp.ne.s32.totalorder %s1729_s23, %s1289_s0  ;;  %s1407_s14 = smov [#allocation10]  }
 0x2af   : > { %s1293_s27 = sshll.u32 %s1407_s14, 4  ;;  %s1294_s27 = int_to_ptr.vmem [resolvable:$false] %s1293_s27 }
 0x2b0   : > { %p1291_p1 = pnand %p1290_p12, %p1625_p5  ;;  %s1295_s28 = scalar_lea.vmem %s1294_s27, 256 }
 0x2b1   : > { %p1296_p4 = scmp.lt.s32.totalorder %s1729_s23, %s1294_s27  ;;  %p1297_p0 = scmp.lt.s32.totalorder %s1295_s28, %s1289_s0 }
 0x2b2   : > { %p1292_p2 = pneg %p1291_p1 }
 0x2b3   : > { %p1298_p9 = por %p1297_p0, %p1296_p4 }
 0x2b5   : > { %p1299_p11 = pnand %p1298_p9, %p1292_p2 }
 0x2b7   : > { %1302 = shalt.err (!%p1299_p11)
}
 0x2b8   : > { %s1303_s8 = scalar_lea.hbm %s1727_s15, 128  ;;  %s1307_s13 = scalar_lea.hbm %s1869_s16, 256 }
 0x2b9   : > { %p1304_p8 = scmp.ne.s32.totalorder %s1727_s15, %s1303_s8  ;;  %p1308_p10 = scmp.lt.u32.totalorder %s1727_s15, %s1869_s16 }
 0x2ba   : > { %p1309_p3 = scmp.lt.u32.totalorder %s1307_s13, %s1303_s8  ;;  %p1311_p12 = scmp.lt.u32.totalorder %s1303_s8, %s1727_s15 }
 0x2bb   : > { %p1305_p13 = pnand %p1304_p8, %p1625_p5 }
 0x2bc   : > { %p1310_p7 = por %p1309_p3, %p1308_p10 }
 0x2bd   : > { %p1306_p6 = pneg %p1305_p13 }
 0x2be   : > { %p1312_p1 = por %p1311_p12, %p1310_p7 }
 0x2c0   : > { %p1313_p2 = pnand %p1312_p1, %p1306_p6 }
 0x2c2   : > { %1316 = shalt.err (!%p1313_p2)
}
 0x2c3   : > { %1067 = dma.vmem_to_hbm [thread:$0]  (%p1625_p5), %s1729_s23, 128, %s1727_s15, %s746_s25   ;;  %v740_v45 = vpop.f32.mrb[2].mxu0 }
 0x2c4   : > { %s1870_s27 = sld [smem:[#allocation22_spill]]  ;;  %s463_s28 = scalar_lea.vmem [#allocation13], %s1673_s9  ;;  %v1034_v47 = vpop.f32.mrb[3].mxu0 }
 0x2c5   : > { %s795_s26 = sshll.u32 %s463_s28, 4  ;;  %s1871_s13 = sld [smem:[#allocation24_spill]]  ;;  %s796_s26 = int_to_ptr.vmem [resolvable:$true] %s795_s26 }
 0x2c6   : > { %s1317_s22 = scalar_lea.vmem %s796_s26, 128  ;;  %s1408_s23 = smov [#allocation13]  }
 0x2c7   : > { %p1318_p4 = scmp.ne.s32.totalorder %s796_s26, %s1317_s22  ;;  %s1321_s15 = sshll.u32 %s1408_s23, 4  ;;  %s1322_s15 = int_to_ptr.vmem [resolvable:$false] %s1321_s15 }
 0x2c8   : > { %s1323_s9 = scalar_lea.vmem %s1322_s15, 256  ;;  %p1324_p11 = scmp.lt.s32.totalorder %s796_s26, %s1322_s15 }
 0x2c9   : > { %p1319_p0 = pnand %p1318_p4, %p1625_p5  ;;  %p1325_p8 = scmp.lt.s32.totalorder %s1323_s9, %s1317_s22 }
 0x2ca   : > { %v977_v44 = vld [vmem:[%s1870_s27] ss:$0 sm:$0xff] }
 0x2cb   : > { %v741_v46 = vadd.f32 %v977_v44, %v740_v45  ;;  %s1787_s21 = scalar_lea.hbm %s1871_s13, %s1705_s30  ;;  %p1320_p9 = pneg %p1319_p0 }
 0x2cc   : > { %p1326_p13 = por %p1325_p8, %p1324_p11 }
 0x2cd   : > { %744 = vst.msk [vmem:[%s463_s28] sm:$0xff] %vm465_vm0, %v741_v46 }
 0x2ce   : > { %p1327_p6 = pnand %p1326_p13, %p1320_p9 }
 0x2d0   : > { %1330 = shalt.err (!%p1327_p6)
}
 0x2d1   : > { %s1331_s30 = scalar_lea.hbm %s1787_s21, 128  ;;  %s1335_s14 = scalar_lea.hbm %s1871_s13, 256 }
 0x2d2   : > { %p1332_p10 = scmp.ne.s32.totalorder %s1787_s21, %s1331_s30  ;;  %p1336_p12 = scmp.lt.u32.totalorder %s1787_s21, %s1871_s13 }
 0x2d3   : > { %p1337_p1 = scmp.lt.u32.totalorder %s1335_s14, %s1331_s30  ;;  %p1339_p4 = scmp.lt.u32.totalorder %s1331_s30, %s1787_s21 }
 0x2d4   : > { %p1333_p3 = pnand %p1332_p10, %p1625_p5 }
 0x2d5   : > { %p1338_p2 = por %p1337_p1, %p1336_p12 }
 0x2d6   : > { %p1334_p7 = pneg %p1333_p3 }
 0x2d7   : > { %p1340_p0 = por %p1339_p4, %p1338_p2 }
 0x2d9   : > { %p1341_p9 = pnand %p1340_p0, %p1334_p7 }
 0x2db   : > { %1344 = shalt.err (!%p1341_p9)
}
 0x2dc   : > { %1069 = dma.vmem_to_hbm [thread:$0]  (%p1625_p5), %s796_s26, 128, %s1787_s21, %s1733_s12  }
 0x2dd PF: > { %s1872_s8 = sld [smem:[#allocation19_spill]]  ;;  %s1873_s29 = sld [smem:[#allocation20_spill]] }
 0x2de   : > { %p1875_p8 = scmp.ge.s32.totalorder %s1395_s20, 2 }
 0x2e3   : > { %s807_s22 = sand.u32 1, %s1872_s8   ;;  %p1874_p11 = scmp.ne.s32.totalorder %s1873_s29, 0 }
 0x2e4   : > { %s808_s23 = scalar_lea.sflag [#allocation4], %s807_s22 }
 0x2e5   : > { %p1088_p13 = pnand %p1875_p8, %p1874_p11 }
 0x2e7   : > { %1374 = dma.done.wait (!%p1088_p13), %s808_s23, 128  }
 0x2e8   : > { %1376 = vsyncadd (!%p1088_p13), %s808_s23, 4294967168  ;;  %s1876_s15 = sadd.s32 4294967294, %s1395_s20  }
 0x2e9   : > { %s816_s9 = sand.u32 1, %s1876_s15  }
 0x2ea   : > { %s817_s30 = scalar_lea.sflag [#allocation12], %s816_s9 }
 0x2eb   : > { %1378 = dma.done.wait (!%p1088_p13), %s817_s30, 256  }
 0x2ec   : > { %1380 = vsyncadd (!%p1088_p13), %s817_s30, 4294967040  ;;  %p30_p5 = scmp.ge.s32.totalorder %s1611_s24, 4   ;;  %s1877_s17 = smov %s1387_s18 }
 0x2ed   : > { %s1878_s18 = smov %s1391_s19  ;;  %s1879_s19 = smov %s1621_s11 }
 0x2ee   : > { %s1880_s20 = smov %s1611_s24  ;;  %32 = sbr.rel (!%p30_p5) target bundleno = 14 (0xe), region = 145 }
 0x2f5   :  { %831 = vsyncpa [#allocation3], 1 }
 0x2f6   :  { %833 = vsyncpa [#allocation3 + $0x1], 1 }
 0x2f7   :  { %834 = vsyncpa [#allocation6], 1 }
 0x2f8   :  { %835 = vsyncpa [#allocation9], 1 }
 0x2f9   :  { %836 = vsyncpa [#allocation4], 1 }
 0x2fa   :  { %838 = vsyncpa [#allocation4 + $0x1], 1 }
 0x2fb   :  { %839 = vsyncpa [#allocation12], 1 }
 0x2fc   :  { %841 = vsyncpa [#allocation12 + $0x1], 1 }

</bundles_post_ra>
